<compile_context>
chip_gen: v6e
topology: v6e:2x2x1
jax: 0.10.0
libtpu: 0.0.40
codegen_flags: <defaults>
</compile_context>

<pallas_src>
import functools

import jax
import jax.numpy as jnp
from jax.experimental import pallas as pl
from jax.experimental.pallas import tpu as pltpu


def _round_up(a, b):
    return ((a + b - 1) // b) * b


def _ce_fl_dice_kernel(x_ref, t_ref,
                       logit_ref, cnt_ref, nll_ref, foc_ref,
                       logit_acc, cnt_acc, nll_acc, foc_acc,
                       *, gamma, ignore_index):
    """Fused per-tile log-softmax + CE / focal / per-class sums.

    x_ref : (C, SB, 128) logits tile (native dtype, cast to f32 in-kernel)
    t_ref : (SB, 128)    int32 targets (padded pixels carry ignore_index)
    logit_ref: (C, 1) f32  sum(logit_c | target==c)
    cnt_ref  : (C, 1) f32  count(target==c)
    nll_ref  : (C, 1) f32  sum(-log p_t | target==c)
    foc_ref  : (1, 1) f32  sum over valid pixels of (1-p_t)^gamma * (-log p_t)
    *_acc  : VMEM scratch accumulators; reduced + stored once at the last step.
    """
    n = pl.program_id(0)
    i = pl.program_id(1)
    first = jnp.logical_and(n == 0, i == 0)
    last = jnp.logical_and(n == pl.num_programs(0) - 1,
                           i == pl.num_programs(1) - 1)

    @pl.when(first)
    def _():
        logit_acc[...] = jnp.zeros_like(logit_acc)
        cnt_acc[...] = jnp.zeros_like(cnt_acc)
        nll_acc[...] = jnp.zeros_like(nll_acc)
        foc_acc[...] = jnp.zeros_like(foc_acc)

    x = x_ref[...].astype(jnp.float32)          # (C, SB, 128)
    t = t_ref[...]                              # (SB, 128) int32

    # log-softmax over channels (leading, untiled axis -> elementwise across
    # vregs; no cross-lane work, no division).
    m = jnp.max(x, axis=0, keepdims=True)                     # (1, SB, 128)
    ex = jnp.exp(x - m)                                       # (C, SB, 128)
    lse = jnp.log(jnp.sum(ex, axis=0, keepdims=True)) + m     # (1, SB, 128)
    logp = x - lse                                            # (C, SB, 128)

    valid = (t != ignore_index).astype(jnp.float32)           # (SB, 128)
    class_ids = jax.lax.broadcasted_iota(jnp.int32, x.shape, 0)
    onehot = (class_ids == t[jnp.newaxis]).astype(jnp.float32)  # (C, SB, 128)

    # per-pixel true-class log prob (0 at ignored / padded pixels)
    logpt = jnp.sum(logp * onehot, axis=0)                    # (SB, 128)
    neg_logpt = -logpt
    pt = jnp.exp(logpt)
    omp = 1.0 - pt
    if gamma == 2.0:
        focal_term = omp * omp
    else:
        focal_term = jnp.exp(gamma * jnp.log(jnp.maximum(omp, 1e-30)))
    focal = focal_term * neg_logpt * valid                    # (SB, 128)
    nll_valid = neg_logpt * valid                             # (SB, 128)

    # Elementwise accumulation into scratch (VALU only); expensive cross-lane
    # reductions and the narrow output stores happen once, at the last step.
    logit_acc[...] += x * onehot
    cnt_acc[...] += onehot
    nll_acc[...] += nll_valid[jnp.newaxis] * onehot
    foc_acc[...] += focal

    @pl.when(last)
    def _():
        def class_reduce(a):                         # (C, SB, 128) -> (C, 1)
            s = jnp.sum(a, axis=1)                   # (C, 128)
            return jnp.sum(s, axis=1, keepdims=True)

        logit_ref[...] = class_reduce(logit_acc[...])
        cnt_ref[...] = class_reduce(cnt_acc[...])
        nll_ref[...] = class_reduce(nll_acc[...])
        f = jnp.sum(foc_acc[...], axis=0, keepdims=True)      # (1, 128)
        foc_ref[...] = jnp.sum(f, axis=1, keepdims=True)      # (1, 1)


def ce_fl_dice_loss(logits, target, *, object_classes, ce_weight=None,
                    ignore_index=255, gamma=2.0, tile_p_max=16384):
    """Exact equivalent of CE_FL_Dice_Loss.forward(input, target).

    logits: (N, C, H, W) float (any float dtype; kept native across the DMA)
    target: (N, H, W) integer class indices (ignore_index allowed)
    object_classes: sequence of class indices used for the dice term.
        # TODO(synk): the original module derives these from an external
        # Cityscapes LABELS table (category == 'object'); pass the trainIds
        # explicitly here.
    """
    N, C, H, W = logits.shape
    HW = H * W
    if 0 <= ignore_index < C:
        raise ValueError("ignore_index must lie outside [0, C)")
    if tile_p_max % 1024 != 0:
        raise ValueError("tile_p_max must be a multiple of 1024")

    # Big lane-dense tiles: SB sublanes (multiple of 8) x 128 lanes per step.
    tile_p = min(tile_p_max, _round_up(HW, 1024))
    SB = tile_p // 128
    HWp = _round_up(HW, tile_p)
    SBtot = HWp // 128
    num_tiles = HWp // tile_p

    # Transpose-free layout plumbing (contiguous reshapes; only the optional
    # pad touches HBM). Padded pixels are marked invalid via ignore_index.
    x = logits.reshape(N, C, HW)
    t = target.reshape(N, HW).astype(jnp.int32)
    if HWp != HW:
        x = jnp.pad(x, ((0, 0), (0, 0), (0, HWp - HW)))
        t = jnp.pad(t, ((0, 0), (0, HWp - HW)), constant_values=ignore_index)
    x = x.reshape(N, C, SBtot, 128)
    t = t.reshape(N, SBtot, 128)

    kernel = functools.partial(_ce_fl_dice_kernel, gamma=float(gamma),
                               ignore_index=int(ignore_index))

    logit_sum, cls_cnt, nll_sum, focal_sum = pl.pallas_call(
        kernel,
        out_shape=(jax.ShapeDtypeStruct((C, 1), jnp.float32),
                   jax.ShapeDtypeStruct((C, 1), jnp.float32),
                   jax.ShapeDtypeStruct((C, 1), jnp.float32),
                   jax.ShapeDtypeStruct((1, 1), jnp.float32)),
        grid=(N, num_tiles),
        in_specs=[
            pl.BlockSpec((None, C, SB, 128), lambda n, i: (n, 0, i, 0)),
            pl.BlockSpec((None, SB, 128), lambda n, i: (n, i, 0)),
        ],
        out_specs=(
            pl.BlockSpec((C, 1), lambda n, i: (0, 0)),
            pl.BlockSpec((C, 1), lambda n, i: (0, 0)),
            pl.BlockSpec((C, 1), lambda n, i: (0, 0)),
            pl.BlockSpec((1, 1), lambda n, i: (0, 0)),
        ),
        scratch_shapes=[
            pltpu.VMEM((C, SB, 128), jnp.float32),   # sum(logit_c * onehot_c)
            pltpu.VMEM((C, SB, 128), jnp.float32),   # sum(onehot_c)
            pltpu.VMEM((C, SB, 128), jnp.float32),   # sum(nll * onehot_c)
            pltpu.VMEM((SB, 128), jnp.float32),      # sum(focal * valid)
        ],
        compiler_params=pltpu.CompilerParams(
            dimension_semantics=("arbitrary", "arbitrary")),
    )(x, t)

    logit_sum = logit_sum[:, 0]    # sum of raw logits where target == c
    cls_cnt = cls_cnt[:, 0]        # #pixels with target == c (valid only)
    nll_sum = nll_sum[:, 0]        # sum of -log p_t where target == c
    focal_total = focal_sum[0, 0]

    # CrossEntropyLoss(weight, ignore_index, reduction='mean')
    if ce_weight is None:
        w = jnp.ones((C,), jnp.float32)
    else:
        w = jnp.asarray(ce_weight, jnp.float32)
    ce_loss = jnp.sum(w * nll_sum) / jnp.sum(w * cls_cnt)

    # FocalLoss(gamma, reduction='mean'): mean over ALL pixels (ignored -> 0)
    fl_loss = focal_total / float(N * H * W)

    # Dice over "object" classes, computed on raw logits (as in the module)
    smooth = 1.0
    if len(object_classes) > 0:
        idx = jnp.asarray(list(object_classes), jnp.int32)
        s = logit_sum[idx]
        cnt = cls_cnt[idx]
        class_loss = 1.0 - (2.0 * s + smooth) / (s + cnt + smooth)
        mean_dice = jnp.sum(class_loss) / float(len(object_classes))
    else:
        mean_dice = jnp.float32(0.0)

    return ce_loss + fl_loss + mean_dice


def _reference_ce_fl_dice(logits, target, object_classes, ce_weight=None,
                          ignore_index=255, gamma=2.0):
    """Pure-JAX mirror of the PyTorch forward, for in-script sanity checking."""
    x = logits.astype(jnp.float32)
    N, C, H, W = x.shape
    logp = jax.nn.log_softmax(x, axis=1)
    valid = (target != ignore_index)
    t_safe = jnp.where(valid, target, 0).astype(jnp.int32)
    logpt = jnp.take_along_axis(logp, t_safe[:, None, :, :], axis=1)[:, 0]
    w = (jnp.ones((C,), jnp.float32) if ce_weight is None
         else jnp.asarray(ce_weight, jnp.float32))
    wt = w[t_safe] * valid.astype(jnp.float32)
    ce = jnp.sum(wt * (-logpt)) / jnp.sum(wt)
    nll = jnp.where(valid, -logpt, 0.0)          # nll_loss(reduction='none')
    pt = jnp.exp(-nll)
    fl = jnp.mean(((1.0 - pt) ** gamma) * nll)
    smooth = 1.0
    dice = 0.0
    for c in object_classes:
        mask = (target == c).astype(jnp.float32)
        s = jnp.sum(x[:, c] * mask)
        cnt = jnp.sum(mask)
        dice += 1.0 - (2.0 * s + smooth) / (s + cnt + smooth)
    mean_dice = dice / len(object_classes) if len(object_classes) else 0.0
    return ce + fl + mean_dice


if __name__ == "__main__":
    key = jax.random.PRNGKey(0)
    k1, k2, k3 = jax.random.split(key, 3)

    N, C, H, W = 2, 4, 16, 16
    IGNORE = 255
    # TODO(synk): object classes come from the external Cityscapes LABELS
    # table in the original module; use a fixed demo subset here.
    OBJECT_CLASSES = (1, 3)

    logits = jax.random.normal(k1, (N, C, H, W), dtype=jnp.float32)
    target = jax.random.randint(k2, (N, H, W), 0, C, dtype=jnp.int32)
    ignore_mask = jax.random.bernoulli(k3, p=0.1, shape=(N, H, W))
    target = jnp.where(ignore_mask, jnp.int32(IGNORE), target)

    loss = ce_fl_dice_loss(logits, target, object_classes=OBJECT_CLASSES,
                           ignore_index=IGNORE)
    loss = jax.block_until_ready(loss)

    ref = jax.block_until_ready(
        _reference_ce_fl_dice(logits, target, OBJECT_CLASSES,
                              ignore_index=IGNORE))
    assert jnp.allclose(loss, ref, atol=1e-4, rtol=1e-4), (loss, ref)

    print("KERNEL_OK")
</pallas_src>

<mosaic_0001>
module attributes {stable_mosaic.version = 11 : i64} {
  func.func @_ce_fl_dice_kernel(%arg0: i32, %arg1: i32, %arg2: memref<1x4x8x128xf32, #tpu.memory_space<vmem>>, %arg3: memref<1x8x128xi32, #tpu.memory_space<vmem>>, %arg4: memref<4x1xf32, #tpu.memory_space<vmem>>, %arg5: memref<4x1xf32, #tpu.memory_space<vmem>>, %arg6: memref<4x1xf32, #tpu.memory_space<vmem>>, %arg7: memref<1x1xf32, #tpu.memory_space<vmem>>, %arg8: memref<4x8x128xf32, #tpu.memory_space<vmem>>, %arg9: memref<4x8x128xf32, #tpu.memory_space<vmem>>, %arg10: memref<4x8x128xf32, #tpu.memory_space<vmem>>, %arg11: memref<8x128xf32, #tpu.memory_space<vmem>>) attributes {dimension_semantics = [#tpu.dimension_semantics<arbitrary>, #tpu.dimension_semantics<arbitrary>], iteration_bounds = array<i64: 2, 1>, scalar_prefetch = 0 : i64, scratch_operands = 4 : i64, tpu.core_type = #tpu.core_type<tc>, window_params = [{transform_indices = @transform_0, window_bounds = array<i64: 1, 4, 8, 128>}, {transform_indices = @transform_1, window_bounds = array<i64: 1, 8, 128>}, {pipeline_mode = #tpu.pipeline_mode<synchronous>, transform_indices = @transform_2, window_bounds = array<i64: 4, 1>}, {pipeline_mode = #tpu.pipeline_mode<synchronous>, transform_indices = @transform_3, window_bounds = array<i64: 4, 1>}, {pipeline_mode = #tpu.pipeline_mode<synchronous>, transform_indices = @transform_4, window_bounds = array<i64: 4, 1>}, {pipeline_mode = #tpu.pipeline_mode<synchronous>, transform_indices = @transform_5, window_bounds = array<i64: 1, 1>}]} {
    %c0_i32 = arith.constant 0 : i32
    %0 = arith.cmpi eq, %arg0, %c0_i32 : i32
    %c0_i32_0 = arith.constant 0 : i32
    %1 = arith.cmpi eq, %arg1, %c0_i32_0 : i32
    %2 = arith.andi %0, %1 : i1
    %c1_i32 = arith.constant 1 : i32
    %3 = arith.cmpi eq, %arg0, %c1_i32 : i32
    %c0_i32_1 = arith.constant 0 : i32
    %4 = arith.cmpi eq, %arg1, %c0_i32_1 : i32
    %5 = arith.andi %3, %4 : i1
    %6 = arith.extui %2 : i1 to i32
    %c0_i32_2 = arith.constant 0 : i32
    %7 = arith.cmpi ne, %6, %c0_i32_2 : i32
    scf.if %7 {
      %cst_36 = arith.constant 0.000000e+00 : f32
      %62 = vector.broadcast %cst_36 : f32 to vector<4x8x128xf32>
      %c0_37 = arith.constant 0 : index
      %c0_38 = arith.constant 0 : index
      %c0_39 = arith.constant 0 : index
      %63 = vector.load %arg8[%c0_37, %c0_38, %c0_39] : memref<4x8x128xf32, #tpu.memory_space<vmem>>, vector<4x8x128xf32>
      tpu.vector_store %arg8[%c0_37, %c0_38, %c0_39], %62 {strides = array<i32>} : memref<4x8x128xf32, #tpu.memory_space<vmem>>, vector<4x8x128xf32>,
      %cst_40 = arith.constant 0.000000e+00 : f32
      %64 = vector.broadcast %cst_40 : f32 to vector<4x8x128xf32>
      %c0_41 = arith.constant 0 : index
      %c0_42 = arith.constant 0 : index
      %c0_43 = arith.constant 0 : index
      %65 = vector.load %arg9[%c0_41, %c0_42, %c0_43] : memref<4x8x128xf32, #tpu.memory_space<vmem>>, vector<4x8x128xf32>
      tpu.vector_store %arg9[%c0_41, %c0_42, %c0_43], %64 {strides = array<i32>} : memref<4x8x128xf32, #tpu.memory_space<vmem>>, vector<4x8x128xf32>,
      %cst_44 = arith.constant 0.000000e+00 : f32
      %66 = vector.broadcast %cst_44 : f32 to vector<4x8x128xf32>
      %c0_45 = arith.constant 0 : index
      %c0_46 = arith.constant 0 : index
      %c0_47 = arith.constant 0 : index
      %67 = vector.load %arg10[%c0_45, %c0_46, %c0_47] : memref<4x8x128xf32, #tpu.memory_space<vmem>>, vector<4x8x128xf32>
      tpu.vector_store %arg10[%c0_45, %c0_46, %c0_47], %66 {strides = array<i32>} : memref<4x8x128xf32, #tpu.memory_space<vmem>>, vector<4x8x128xf32>,
      %cst_48 = arith.constant 0.000000e+00 : f32
      %68 = vector.broadcast %cst_48 : f32 to vector<8x128xf32>
      %c0_49 = arith.constant 0 : index
      %c0_50 = arith.constant 0 : index
      %69 = vector.load %arg11[%c0_49, %c0_50] : memref<8x128xf32, #tpu.memory_space<vmem>>, vector<8x128xf32>
      tpu.vector_store %arg11[%c0_49, %c0_50], %68 {strides = array<i32>} : memref<8x128xf32, #tpu.memory_space<vmem>>, vector<8x128xf32>,
    } else {
    }
    %c0 = arith.constant 0 : index
    %c0_3 = arith.constant 0 : index
    %c0_4 = arith.constant 0 : index
    %c0_5 = arith.constant 0 : index
    %8 = vector.load %arg2[%c0, %c0_3, %c0_4, %c0_5] : memref<1x4x8x128xf32, #tpu.memory_space<vmem>>, vector<1x4x8x128xf32>
    %9 = vector.shape_cast %8 : vector<1x4x8x128xf32> to vector<4x8x128xf32>
    %c0_6 = arith.constant 0 : index
    %c0_7 = arith.constant 0 : index
    %c0_8 = arith.constant 0 : index
    %10 = vector.load %arg3[%c0_6, %c0_7, %c0_8] : memref<1x8x128xi32, #tpu.memory_space<vmem>>, vector<1x8x128xi32>
    %11 = vector.shape_cast %10 : vector<1x8x128xi32> to vector<8x128xi32>
    %cst = arith.constant dense<0xFF800000> : vector<8x128xf32>
    %12 = vector.multi_reduction <maximumf>, %9, %cst [0] : vector<4x8x128xf32> to vector<8x128xf32>
    %13 = vector.shape_cast %12 : vector<8x128xf32> to vector<1x8x128xf32>
    %14 = vector.broadcast %13 : vector<1x8x128xf32> to vector<4x8x128xf32>
    %15 = arith.subf %9, %14 : vector<4x8x128xf32>
    %16 = math.exp %15 : vector<4x8x128xf32>
    %cst_9 = arith.constant dense<0.000000e+00> : vector<8x128xf32>
    %17 = vector.multi_reduction <add>, %16, %cst_9 [0] : vector<4x8x128xf32> to vector<8x128xf32>
    %18 = vector.shape_cast %17 : vector<8x128xf32> to vector<1x8x128xf32>
    %19 = math.log %18 : vector<1x8x128xf32>
    %20 = arith.addf %19, %13 : vector<1x8x128xf32>
    %21 = vector.broadcast %20 : vector<1x8x128xf32> to vector<4x8x128xf32>
    %22 = arith.subf %9, %21 : vector<4x8x128xf32>
    %c255_i32 = arith.constant 255 : i32
    %23 = vector.broadcast %c255_i32 : i32 to vector<8x128xi32>
    %24 = arith.cmpi ne, %11, %23 : vector<8x128xi32>
    %25 = arith.extui %24 : vector<8x128xi1> to vector<8x128xi32>
    %26 = arith.sitofp %25 : vector<8x128xi32> to vector<8x128xf32>
    %27 = tpu.iota {dimensions = array<i32: 0>} : vector<4x8x128xi32>
    %28 = vector.shape_cast %11 : vector<8x128xi32> to vector<1x8x128xi32>
    %29 = vector.broadcast %28 : vector<1x8x128xi32> to vector<4x8x128xi32>
    %30 = arith.cmpi eq, %27, %29 : vector<4x8x128xi32>
    %31 = arith.extui %30 : vector<4x8x128xi1> to vector<4x8x128xi32>
    %32 = arith.sitofp %31 : vector<4x8x128xi32> to vector<4x8x128xf32>
    %33 = arith.mulf %22, %32 : vector<4x8x128xf32>
    %cst_10 = arith.constant dense<0.000000e+00> : vector<8x128xf32>
    %34 = vector.multi_reduction <add>, %33, %cst_10 [0] : vector<4x8x128xf32> to vector<8x128xf32>
    %cst_11 = arith.constant 0.000000e+00 : f32
    %35 = vector.broadcast %cst_11 : f32 to vector<8x128xf32>
    %36 = arith.subf %35, %34 : vector<8x128xf32>
    %37 = math.exp %34 : vector<8x128xf32>
    %cst_12 = arith.constant 1.000000e+00 : f32
    %38 = vector.broadcast %cst_12 : f32 to vector<8x128xf32>
    %39 = arith.subf %38, %37 : vector<8x128xf32>
    %40 = arith.mulf %39, %39 : vector<8x128xf32>
    %41 = arith.mulf %40, %36 : vector<8x128xf32>
    %42 = arith.mulf %41, %26 : vector<8x128xf32>
    %43 = arith.mulf %36, %26 : vector<8x128xf32>
    %c0_13 = arith.constant 0 : index
    %c0_14 = arith.constant 0 : index
    %c0_15 = arith.constant 0 : index
    %44 = vector.load %arg8[%c0_13, %c0_14, %c0_15] : memref<4x8x128xf32, #tpu.memory_space<vmem>>, vector<4x8x128xf32>
    %45 = arith.mulf %9, %32 : vector<4x8x128xf32>
    %46 = arith.addf %44, %45 : vector<4x8x128xf32>
    %c0_16 = arith.constant 0 : index
    %c0_17 = arith.constant 0 : index
    %c0_18 = arith.constant 0 : index
    %47 = vector.load %arg8[%c0_16, %c0_17, %c0_18] : memref<4x8x128xf32, #tpu.memory_space<vmem>>, vector<4x8x128xf32>
    tpu.vector_store %arg8[%c0_16, %c0_17, %c0_18], %46 {strides = array<i32>} : memref<4x8x128xf32, #tpu.memory_space<vmem>>, vector<4x8x128xf32>,
    %c0_19 = arith.constant 0 : index
    %c0_20 = arith.constant 0 : index
    %c0_21 = arith.constant 0 : index
    %48 = vector.load %arg9[%c0_19, %c0_20, %c0_21] : memref<4x8x128xf32, #tpu.memory_space<vmem>>, vector<4x8x128xf32>
    %49 = arith.addf %48, %32 : vector<4x8x128xf32>
    %c0_22 = arith.constant 0 : index
    %c0_23 = arith.constant 0 : index
    %c0_24 = arith.constant 0 : index
    %50 = vector.load %arg9[%c0_22, %c0_23, %c0_24] : memref<4x8x128xf32, #tpu.memory_space<vmem>>, vector<4x8x128xf32>
    tpu.vector_store %arg9[%c0_22, %c0_23, %c0_24], %49 {strides = array<i32>} : memref<4x8x128xf32, #tpu.memory_space<vmem>>, vector<4x8x128xf32>,
    %c0_25 = arith.constant 0 : index
    %c0_26 = arith.constant 0 : index
    %c0_27 = arith.constant 0 : index
    %51 = vector.load %arg10[%c0_25, %c0_26, %c0_27] : memref<4x8x128xf32, #tpu.memory_space<vmem>>, vector<4x8x128xf32>
    %52 = vector.shape_cast %43 : vector<8x128xf32> to vector<1x8x128xf32>
    %53 = vector.broadcast %52 : vector<1x8x128xf32> to vector<4x8x128xf32>
    %54 = arith.mulf %53, %32 : vector<4x8x128xf32>
    %55 = arith.addf %51, %54 : vector<4x8x128xf32>
    %c0_28 = arith.constant 0 : index
    %c0_29 = arith.constant 0 : index
    %c0_30 = arith.constant 0 : index
    %56 = vector.load %arg10[%c0_28, %c0_29, %c0_30] : memref<4x8x128xf32, #tpu.memory_space<vmem>>, vector<4x8x128xf32>
    tpu.vector_store %arg10[%c0_28, %c0_29, %c0_30], %55 {strides = array<i32>} : memref<4x8x128xf32, #tpu.memory_space<vmem>>, vector<4x8x128xf32>,
    %c0_31 = arith.constant 0 : index
    %c0_32 = arith.constant 0 : index
    %57 = vector.load %arg11[%c0_31, %c0_32] : memref<8x128xf32, #tpu.memory_space<vmem>>, vector<8x128xf32>
    %58 = arith.addf %57, %42 : vector<8x128xf32>
    %c0_33 = arith.constant 0 : index
    %c0_34 = arith.constant 0 : index
    %59 = vector.load %arg11[%c0_33, %c0_34] : memref<8x128xf32, #tpu.memory_space<vmem>>, vector<8x128xf32>
    tpu.vector_store %arg11[%c0_33, %c0_34], %58 {strides = array<i32>} : memref<8x128xf32, #tpu.memory_space<vmem>>, vector<8x128xf32>,
    %60 = arith.extui %5 : i1 to i32
    %c0_i32_35 = arith.constant 0 : i32
    %61 = arith.cmpi ne, %60, %c0_i32_35 : i32
    scf.if %61 {
      %c0_36 = arith.constant 0 : index
      %c0_37 = arith.constant 0 : index
      %c0_38 = arith.constant 0 : index
      %62 = vector.load %arg8[%c0_36, %c0_37, %c0_38] : memref<4x8x128xf32, #tpu.memory_space<vmem>>, vector<4x8x128xf32>
      %cst_39 = arith.constant dense<0.000000e+00> : vector<4x128xf32>
      %63 = vector.multi_reduction <add>, %62, %cst_39 [1] : vector<4x8x128xf32> to vector<4x128xf32>
      %cst_40 = arith.constant dense<0.000000e+00> : vector<4xf32>
      %64 = vector.multi_reduction <add>, %63, %cst_40 [1] : vector<4x128xf32> to vector<4xf32>
      %65 = vector.shape_cast %64 : vector<4xf32> to vector<4x1xf32>
      %c0_41 = arith.constant 0 : index
      %c0_42 = arith.constant 0 : index
      %66 = vector.load %arg4[%c0_41, %c0_42] : memref<4x1xf32, #tpu.memory_space<vmem>>, vector<4x1xf32>
      tpu.vector_store %arg4[%c0_41, %c0_42], %65 {strides = array<i32>} : memref<4x1xf32, #tpu.memory_space<vmem>>, vector<4x1xf32>,
      %c0_43 = arith.constant 0 : index
      %c0_44 = arith.constant 0 : index
      %c0_45 = arith.constant 0 : index
      %67 = vector.load %arg9[%c0_43, %c0_44, %c0_45] : memref<4x8x128xf32, #tpu.memory_space<vmem>>, vector<4x8x128xf32>
      %cst_46 = arith.constant dense<0.000000e+00> : vector<4x128xf32>
      %68 = vector.multi_reduction <add>, %67, %cst_46 [1] : vector<4x8x128xf32> to vector<4x128xf32>
      %cst_47 = arith.constant dense<0.000000e+00> : vector<4xf32>
      %69 = vector.multi_reduction <add>, %68, %cst_47 [1] : vector<4x128xf32> to vector<4xf32>
      %70 = vector.shape_cast %69 : vector<4xf32> to vector<4x1xf32>
      %c0_48 = arith.constant 0 : index
      %c0_49 = arith.constant 0 : index
      %71 = vector.load %arg5[%c0_48, %c0_49] : memref<4x1xf32, #tpu.memory_space<vmem>>, vector<4x1xf32>
      tpu.vector_store %arg5[%c0_48, %c0_49], %70 {strides = array<i32>} : memref<4x1xf32, #tpu.memory_space<vmem>>, vector<4x1xf32>,
      %c0_50 = arith.constant 0 : index
      %c0_51 = arith.constant 0 : index
      %c0_52 = arith.constant 0 : index
      %72 = vector.load %arg10[%c0_50, %c0_51, %c0_52] : memref<4x8x128xf32, #tpu.memory_space<vmem>>, vector<4x8x128xf32>
      %cst_53 = arith.constant dense<0.000000e+00> : vector<4x128xf32>
      %73 = vector.multi_reduction <add>, %72, %cst_53 [1] : vector<4x8x128xf32> to vector<4x128xf32>
      %cst_54 = arith.constant dense<0.000000e+00> : vector<4xf32>
      %74 = vector.multi_reduction <add>, %73, %cst_54 [1] : vector<4x128xf32> to vector<4xf32>
      %75 = vector.shape_cast %74 : vector<4xf32> to vector<4x1xf32>
      %c0_55 = arith.constant 0 : index
      %c0_56 = arith.constant 0 : index
      %76 = vector.load %arg6[%c0_55, %c0_56] : memref<4x1xf32, #tpu.memory_space<vmem>>, vector<4x1xf32>
      tpu.vector_store %arg6[%c0_55, %c0_56], %75 {strides = array<i32>} : memref<4x1xf32, #tpu.memory_space<vmem>>, vector<4x1xf32>,
      %c0_57 = arith.constant 0 : index
      %c0_58 = arith.constant 0 : index
      %77 = vector.load %arg11[%c0_57, %c0_58] : memref<8x128xf32, #tpu.memory_space<vmem>>, vector<8x128xf32>
      %cst_59 = arith.constant dense<0.000000e+00> : vector<128xf32>
      %78 = vector.multi_reduction <add>, %77, %cst_59 [0] : vector<8x128xf32> to vector<128xf32>
      %79 = vector.shape_cast %78 : vector<128xf32> to vector<1x128xf32>
      %cst_60 = arith.constant dense<0.000000e+00> : vector<1xf32>
      %80 = vector.multi_reduction <add>, %79, %cst_60 [1] : vector<1x128xf32> to vector<1xf32>
      %81 = vector.shape_cast %80 : vector<1xf32> to vector<1x1xf32>
      %c0_61 = arith.constant 0 : index
      %c0_62 = arith.constant 0 : index
      %82 = vector.load %arg7[%c0_61, %c0_62] : memref<1x1xf32, #tpu.memory_space<vmem>>, vector<1x1xf32>
      tpu.vector_store %arg7[%c0_61, %c0_62], %81 {strides = array<i32>} : memref<1x1xf32, #tpu.memory_space<vmem>>, vector<1x1xf32>,
    } else {
    }
    return
  }
  func.func @transform_0(%arg0: i32, %arg1: i32) -> (i32, i32, i32, i32) {
    %c0_i32 = arith.constant 0 : i32
    %c0_i32_0 = arith.constant 0 : i32
    %c0_i32_1 = arith.constant 0 : i32
    return %arg0, %c0_i32, %arg1, %c0_i32_0 : i32, i32, i32, i32
  }
  func.func @transform_1(%arg0: i32, %arg1: i32) -> (i32, i32, i32) {
    %c0_i32 = arith.constant 0 : i32
    %c0_i32_0 = arith.constant 0 : i32
    return %arg0, %arg1, %c0_i32 : i32, i32, i32
  }
  func.func @transform_2(%arg0: i32, %arg1: i32) -> (i32, i32) {
    %c0_i32 = arith.constant 0 : i32
    %c0_i32_0 = arith.constant 0 : i32
    %c0_i32_1 = arith.constant 0 : i32
    return %c0_i32, %c0_i32_0 : i32, i32
  }
  func.func @transform_3(%arg0: i32, %arg1: i32) -> (i32, i32) {
    %c0_i32 = arith.constant 0 : i32
    %c0_i32_0 = arith.constant 0 : i32
    %c0_i32_1 = arith.constant 0 : i32
    return %c0_i32, %c0_i32_0 : i32, i32
  }
  func.func @transform_4(%arg0: i32, %arg1: i32) -> (i32, i32) {
    %c0_i32 = arith.constant 0 : i32
    %c0_i32_0 = arith.constant 0 : i32
    %c0_i32_1 = arith.constant 0 : i32
    return %c0_i32, %c0_i32_0 : i32, i32
  }
  func.func @transform_5(%arg0: i32, %arg1: i32) -> (i32, i32) {
    %c0_i32 = arith.constant 0 : i32
    %c0_i32_0 = arith.constant 0 : i32
    %c0_i32_1 = arith.constant 0 : i32
    return %c0_i32, %c0_i32_0 : i32, i32
  }
}

</mosaic_0001>

<bundles_post_ra>
// kernel: tpu_custom_call.1
= control target key start
LH: loop header
LB: loop body
LE: loop exit
PB: predicated region body
PF: predicated region fallthrough
CT: control target
= control target key end

     0   :  { %11 = vsyncpa [#allocation7], 0  ;;  %s1157_s0 = inlined_call_operand.hbm [shape: f32[2,4,8,128], index: 0, kind: input, shape index: {}]   ;;  %s1158_s1 = inlined_call_operand.hbm [shape: s32[2,8,128], index: 1, kind: input, shape index: {}]   ;;  %s1159_s2 = inlined_call_operand.vmem [shape: f32[4,1], index: 2, kind: output, shape index: {0}]   ;;  %s1160_s3 = inlined_call_operand.vmem [shape: f32[4,1], index: 3, kind: output, shape index: {1}]   ;;  %s1161_s4 = inlined_call_operand.vmem [shape: f32[4,1], index: 4, kind: output, shape index: {2}]   ;;  %s1162_s5 = inlined_call_operand.hbm [shape: f32[1,1], index: 5, kind: output, shape index: {3}]  }
   0x1   :  { %13 = vsyncpa [#allocation7 + $0x1], 0 }
   0x2   :  { %14 = vsyncpa [#allocation10], 0 }
   0x3   :  { %16 = vsyncpa [#allocation10 + $0x1], 0 }
   0x4   :  { %17 = vsyncpa [#allocation8], 0  ;;  %s940_s18 = smov 0   ;;  %s942_s19 = smov 0  }
   0x5   :  { %s944_s20 = smov 0   ;;  %s946_s21 = smov 0  }
   0x6   :  { %s948_s22 = smov 0   ;;  %s950_s23 = smov 0  }
   0x7 LB: > { %s1163_s24 = sadd.s32 4294967295, %s901_s23   ;;  %s35_s25 = sadd.s32 1, %s897_s22  ;;  %s901_s23 = sphi %s950_s23, %s23_s23   ;;  %s897_s22 = sphi %s948_s22, %s1174_s22   ;;  %s893_s21 = sphi %s946_s21, %s1173_s21   ;;  %s889_s20 = sphi %s944_s20, %s1172_s20   ;;  %s885_s19 = sphi %s942_s19, %s1171_s19   ;;  %s881_s18 = sphi %s940_s18, %s1170_s18  }
   0x8   : > { %p37_p0 = scmp.ge.s32.totalorder %s35_s25, 2  ;;  %s44_s26 = sadd.s32 1, %s889_s20 }
   0x9   : > { %p51_p1 = scmp.ne.s32.totalorder %s889_s20, %s885_s19  ;;  %p52_p2 = scmp.eq.s32.totalorder %s901_s23, 0 }
   0xa   : > { %s1176_s25 = smov (%p37_p0, %s35_s25), 0  ;;  %p57_p4 = scmp.ne.s32.totalorder %s885_s19, %s881_s18 }
   0xb   : > { %p976_p3 = por %p52_p2, %p51_p1  ;;  %s39_s28 = ssub.s32 %s897_s22, %s1176_s25 }
   0xc   : > { %p58_p5 = scmp.eq.s32.totalorder %s1163_s24, 0  ;;  %p42_p6 = scmp.eq.s32.totalorder %s39_s28, 0 }
   0xd   : > { %p695_p8 = scmp.lt.s32.totalorder %s901_s23, 2  ;;  %s994_s6 = sand.u32 1, %s889_s20  }
   0xe   : > { %p985_p7 = por %p58_p5, %p57_p4  ;;  %s677_s7 = sshll.u32 %s897_s22, 9 }
   0xf   : > { %s991_s30 = scalar_select %p42_p6, %s889_s20, %s44_s26  }
  0x10   : > { %s658_s8 = sshll.u32 %s994_s6, 5  ;;  %s204_s11 = scalar_lea.hbm %s1157_s0, %s677_s7 }
  0x11   : > { %s197_s12 = scalar_lea.vmem [#allocation6], %s658_s8  ;;  %p1003_p9 = pnand %p695_p8, %p976_p3 }
  0x12   : > { %s205_s13 = sshll.u32 %s197_s12, 4  ;;  %s194_s15 = scalar_lea.sflag [#allocation7], %s994_s6  ;;  %s206_s13 = int_to_ptr.vmem [resolvable:$true] %s205_s13 }
  0x13   : > { %p765_p10 = pneg %p1003_p9  ;;  %s776_s16 = scalar_lea.vmem %s206_s13, 512 }
  0x14   : > { %p777_p11 = scmp.ne.s32.totalorder %s206_s13, %s776_s16  ;;  %s903_s17 = smov [#allocation6]  }
  0x15   : > { %s781_s18 = sshll.u32 %s903_s17, 4  ;;  %s782_s18 = int_to_ptr.vmem [resolvable:$false] %s781_s18 }
  0x16   : > { %p779_p12 = pnand %p777_p11, %p765_p10  ;;  %s783_s26 = scalar_lea.vmem %s782_s18, 1024 }
  0x17   : > { %p784_p0 = scmp.lt.s32.totalorder %s206_s13, %s782_s18  ;;  %p785_p1 = scmp.lt.s32.totalorder %s783_s26, %s776_s16 }
  0x18   : > { %p780_p13 = pneg %p779_p12 }
  0x19   : > { %p786_p2 = por %p785_p1, %p784_p0 }
  0x1b   : > { %p787_p3 = pnand %p786_p2, %p780_p13 }
  0x1d   : > { %790 = shalt.err (!%p787_p3)
}
  0x1e   : > { %s904_s27 = smov 128   ;;  %s905_s28 = smov 8  }
  0x1f   : > { %691 = dma.hbm_to_vmem [thread:$0]  (!%p1003_p9), %s204_s11, 512, %s206_s13, %s194_s15, %s904_s27, %s904_s27, %s905_s28  }
  0x20   : > { %p663_p4 = scmp.ge.s32.totalorder %s901_s23, 1  ;;  %p232_p5 = scmp.lt.s32.totalorder %s901_s23, 3 }
  0x21   : > { %s661_s7 = sshll.u32 %s994_s6, 3  ;;  %s662_s9 = sshll.u32 %s897_s22, 7 }
  0x22   : > { %p1018_p6 = pnand %p663_p4, %p232_p5  ;;  %s219_s10 = scalar_lea.vmem [#allocation9], %s661_s7 }
  0x23   : > { %s227_s12 = sshll.u32 %s219_s10, 4  ;;  %s225_s18 = scalar_lea.hbm %s1158_s1, %s662_s9  ;;  %s228_s12 = int_to_ptr.vmem [resolvable:$true] %s227_s12 }
  0x24   : > { %s216_s26 = scalar_lea.sflag [#allocation10], %s994_s6  ;;  %s804_s24 = scalar_lea.vmem %s228_s12, 128 }
  0x25   : > { %p805_p8 = scmp.ne.s32.totalorder %s228_s12, %s804_s24  ;;  %s906_s11 = smov [#allocation9]  }
  0x26   : > { %s809_s13 = sshll.u32 %s906_s11, 4  ;;  %s810_s13 = int_to_ptr.vmem [resolvable:$false] %s809_s13 }
  0x27   : > { %p807_p11 = pnand %p805_p8, %p765_p10  ;;  %s811_s15 = scalar_lea.vmem %s810_s13, 256 }
  0x28   : > { %p812_p13 = scmp.lt.s32.totalorder %s228_s12, %s810_s13  ;;  %p813_p0 = scmp.lt.s32.totalorder %s811_s15, %s804_s24 }
  0x29   : > { %p808_p12 = pneg %p807_p11 }
  0x2a   : > { %p814_p1 = por %p813_p0, %p812_p13 }
  0x2c   : > { %p815_p2 = pnand %p814_p1, %p808_p12 }
  0x2e   : > { %818 = shalt.err (!%p815_p2)
}
  0x2f   : > { %694 = dma.hbm_to_vmem [thread:$0]  (!%p1003_p9), %s225_s18, 128, %s228_s12, %s216_s26  }
  0x30   : > { %236 = sbr.rel (%p1018_p6) target bundleno = 326 (0x146), region = 28  ;;  %s238_s6 = sand.u32 (!%p1018_p6), 1, %s885_s19  }
  0x31   : > { %s664_s27 = sshll.u32 (!%p1018_p6), %s238_s6, 5  ;;  %s239_s28 = scalar_lea.sflag (!%p1018_p6), [#allocation7], %s238_s6 }
  0x32   : > { %s1035_s7 = scalar_lea.vmem (!%p1018_p6), [#allocation6], %s664_s27 }
  0x35   : > { %868 = dma.done.wait (%p985_p7), %s239_s28, 512  }
  0x36   : > { %870 = vsyncadd (%p985_p7), %s239_s28, 4294966784  ;;  %s665_s24 = sshll.u32 %s238_s6, 3  ;;  %s248_s9 = scalar_lea.sflag [#allocation10], %s238_s6 }
  0x37   : > { %s251_s14 = scalar_lea.vmem [#allocation9], %s665_s24 }
  0x38   : > { %872 = dma.done.wait (%p985_p7), %s248_s9, 128  }
  0x39   : > { %874 = vsyncadd (%p985_p7), %s248_s9, 4294967168  ;;  %p278_p9 = scmp.eq.s32.totalorder %s893_s21, 0  ;;  %p282_p10 = scmp.eq.s32.totalorder %s893_s21, 1 }
  0x3a   : > { %v907_v0 = vmov (%p278_p9), 0.0  }
  0x3b   : > { %286 = sbr.rel (!%p278_p9) target bundleno = 66 (0x42), region = 40  ;;  %287 = vst [vmem:[#allocation2 + $0x10] sm:$0xff] (%p278_p9), %v907_v0  ;;  %288 = vst [vmem:[#allocation2] sm:$0xff] (%p278_p9), %v907_v0 }
  0x3c   : > { %289 = vst [vmem:[#allocation2 + $0x18] sm:$0xff] (%p278_p9), %v907_v0  ;;  %290 = vst [vmem:[#allocation2 + $0x8] sm:$0xff] (%p278_p9), %v907_v0 }
  0x3d   : > { %291 = vst [vmem:[#allocation3] sm:$0xff] (%p278_p9), %v907_v0  ;;  %292 = vst [vmem:[#allocation3 + $0x18] sm:$0xff] (%p278_p9), %v907_v0 }
  0x3e   : > { %293 = vst [vmem:[#allocation3 + $0x8] sm:$0xff] (%p278_p9), %v907_v0  ;;  %294 = vst [vmem:[#allocation3 + $0x10] sm:$0xff] (%p278_p9), %v907_v0 }
  0x3f   : > { %295 = vst [vmem:[#allocation4] sm:$0xff] (%p278_p9), %v907_v0  ;;  %296 = vst [vmem:[#allocation4 + $0x8] sm:$0xff] (%p278_p9), %v907_v0 }
  0x40   : > { %297 = vst [vmem:[#allocation4 + $0x10] sm:$0xff] %v907_v0  ;;  %298 = vst [vmem:[#allocation4 + $0x18] sm:$0xff] %v907_v0 }
  0x41   : > { %299 = vst [vmem:[#allocation5] sm:$0xff] %v907_v0 }
  0x42 PF: > { %v1048_v1 = vld [vmem:[%s1035_s7] sm:$0xff]  ;;  %v1054_v4 = vld [vmem:[%s1035_s7 + $0x8] sm:$0xff]  ;;  %v1058_v5 = vld [vmem:[%s1035_s7 + $0x10] sm:$0xff]  ;;  %v908_v6 = vmov 0.0   ;;  %vm441_vm5 = vcmask (%p282_p10), 1041409   ;;  %vm443_vm6 = vcmask (%p282_p10), 1042434  }
  0x43   : > { %v1050_v2 = vld [vmem:[%s251_s14] sm:$0xff]  ;;  %v305_v8 = vmax.f32 %v1048_v1, %v1054_v4  ;;  %v303_v13 = vld [vmem:[%s1035_s7 + $0x18] sm:$0xff]  ;;  %vm445_vm7 = vcmask (%p282_p10), 1043459   ;;  %vm448_vm8 = vcmask (%p282_p10), 1043456   ;;  %vm452_vm9 = vcmask (%p282_p10), 3072  }
  0x44   : > { %vm333_vm0 = vcmp.eq.s32.totalorder %v1050_v2, 0  ;;  %v360_v3 = vld [vmem:[#allocation2 + $0x10] sm:$0xff]  ;;  %vm334_vm1 = vcmp.eq.s32.totalorder %v1050_v2, 1  ;;  %vm335_vm2 = vcmp.eq.s32.totalorder %v1050_v2, 2  ;;  %v361_v10 = vld [vmem:[#allocation2] sm:$0xff]  ;;  %v306_v17 = vmax.f32 %v1058_v5, %v303_v13 }
  0x45   : > { %v1062_v7 = vsel %vm333_vm0, 1.0, %v908_v6  ;;  %v1067_v9 = vsel %vm334_vm1, 1.0, %v908_v6  ;;  %v1070_v11 = vsel %vm335_vm2, 1.0, %v908_v6  ;;  %v362_v12 = vld [vmem:[#allocation2 + $0x18] sm:$0xff]  ;;  %vm336_vm3 = vcmp.eq.s32.totalorder %v1050_v2, 3  ;;  %v363_v34 = vld [vmem:[#allocation2 + $0x8] sm:$0xff] }
  0x46   : > { %v364_v14 = vmul.f32 %v1062_v7, %v1048_v1  ;;  %v365_v15 = vmul.f32 %v1067_v9, %v1054_v4  ;;  %v366_v16 = vmul.f32 %v1070_v11, %v1058_v5  ;;  %v376_v18 = vld [vmem:[#allocation3] sm:$0xff]  ;;  %v377_v19 = vld [vmem:[#allocation3 + $0x18] sm:$0xff]  ;;  %v307_v27 = vmax.f32 %v305_v8, %v306_v17 }
  0x47   : > { %v378_v20 = vld [vmem:[#allocation3 + $0x8] sm:$0xff]  ;;  %v380_v21 = vadd.f32 %v1062_v7, %v376_v18  ;;  %v381_v22 = vadd.f32 %v1067_v9, %v377_v19  ;;  %v379_v28 = vld [vmem:[#allocation3 + $0x10] sm:$0xff]  ;;  %v672_v29 = vsel %vm336_vm3, 1.0, %v908_v6  ;;  %vm330_vm4 = vcmp.ne.s32.totalorder %v1050_v2, 255 }
  0x48   : > { %v382_v23 = vadd.f32 %v1070_v11, %v378_v20  ;;  %v368_v24 = vadd.f32 %v364_v14, %v360_v3  ;;  %v369_v25 = vadd.f32 %v365_v15, %v361_v10  ;;  %v370_v26 = vadd.f32 %v366_v16, %v362_v12  ;;  %v391_v10 = vld [vmem:[#allocation4 + $0x18] sm:$0xff] }
  0x49   : > { %384 = vst [vmem:[#allocation3] sm:$0xff] %v380_v21  ;;  %385 = vst [vmem:[#allocation3 + $0x18] sm:$0xff] %v381_v22  ;;  %v308_v30 = vsub.f32 %v1048_v1, %v307_v27  ;;  %v309_v31 = vsub.f32 %v1054_v4, %v307_v27  ;;  %v310_v32 = vsub.f32 %v1058_v5, %v307_v27  ;;  %v668_v63 = vsel %vm330_vm4, 1.0, %v908_v6  ;;  %v390_v8 = vld [vmem:[#allocation4 + $0x10] sm:$0xff]  ;;  %v404_v22 = vld [vmem:[#allocation5] sm:$0xff] }
  0x4a   : > { %386 = vst [vmem:[#allocation3 + $0x8] sm:$0xff] %v382_v23  ;;  %372 = vst [vmem:[#allocation2 + $0x10] sm:$0xff] %v368_v24  ;;  %v311_v33 = vsub.f32 %v303_v13, %v307_v27  ;;  %v367_v35 = vmul.f32 %v672_v29, %v303_v13  ;;  %v383_v36 = vadd.f32 %v672_v29, %v379_v28  ;;  %vm543_vm10 = vcmask (%p282_p10), 0  }
  0x4b   : > { %373 = vst [vmem:[#allocation2] sm:$0xff] %v369_v25  ;;  %374 = vst [vmem:[#allocation2 + $0x18] sm:$0xff] %v370_v26  ;;  %v312_v37 = vmul.f32 1.442695, %v308_v30  ;;  %v314_v38 = vmul.f32 1.442695, %v309_v31 }
  0x4c   : > { %v316_v39 = vmul.f32 1.442695, %v310_v32  ;;  %v318_v40 = vmul.f32 1.442695, %v311_v33  ;;  %v371_v41 = vadd.f32 %v367_v35, %v363_v34  ;;  %387 = vst [vmem:[#allocation3 + $0x10] sm:$0xff] %v383_v36 }
  0x4d   : > { %751 = vpow2.f32 %v312_v37 }
  0x4e   : > { %753 = vpow2.f32 %v314_v38  ;;  %375 = vst [vmem:[#allocation2 + $0x8] sm:$0xff] %v371_v41 }
  0x4f   : > { %755 = vpow2.f32 %v316_v39 }
  0x50   : > { %757 = vpow2.f32 %v318_v40 }
  0x51   : > { %v409_v28 = vld [vmem:[#allocation2 + $0x10] sm:$0xff] (%p282_p10) }
  0x52   : > { %v410_v31 = vld [vmem:[#allocation2] sm:$0xff] (%p282_p10)  ;;  %v411_v32 = vld [vmem:[#allocation2 + $0x18] sm:$0xff] (%p282_p10)  ;;  %v413_v34 = vrot.slane (%p282_p10), %v409_v28, 4 }
  0x53   : > { %v419_v37 = vrot.slane (%p282_p10), %v410_v31, 4  ;;  %v425_v38 = vrot.slane (%p282_p10), %v411_v32, 4 }
  0x54   : > { %v414_v41 = vadd.f32 (%p282_p10), %v413_v34, %v409_v28 }
  0x55   : > { %v412_v33 = vld [vmem:[#allocation2 + $0x8] sm:$0xff] (%p282_p10) }
  0x5a   : > { %v752_v42 = vpop.eup %751 }
  0x5b   : > { %v754_v43 = vpop.eup %753 }
  0x5c   : > { %v756_v44 = vpop.eup %755  ;;  %v320_v45 = vadd.f32 %v754_v43, %v752_v42  ;;  %v431_v42 = vrot.slane (%p282_p10), %v412_v33, 4 }
  0x5d   : > { %v758_v46 = vpop.eup %757 }
  0x5e   : > { %v321_v47 = vadd.f32 %v756_v44, %v320_v45  ;;  %v420_v45 = vadd.f32 (%p282_p10), %v419_v37, %v410_v31 }
  0x60   : > { %v322_v48 = vadd.f32 %v758_v46, %v321_v47  ;;  %v426_v46 = vadd.f32 (%p282_p10), %v425_v38, %v411_v32 }
  0x62   : > { %759 = vlog2.f32 %v322_v48 }
  0x6f   : > { %v760_v49 = vpop.eup %759 }
  0x70   : > { %v324_v50 = vmul.f32 0.6931472, %v760_v49  ;;  %v415_v49 = vrot.slane (%p282_p10), %v414_v41, 2 }
  0x72   : > { %v325_v51 = vadd.f32 %v324_v50, %v307_v27  ;;  %v432_v50 = vadd.f32 (%p282_p10), %v431_v42, %v412_v33 }
  0x74   : > { %v329_v52 = vsub.f32 %v303_v13, %v325_v51  ;;  %v326_v53 = vsub.f32 %v1048_v1, %v325_v51  ;;  %v327_v54 = vsub.f32 %v1054_v4, %v325_v51  ;;  %v328_v55 = vsub.f32 %v1058_v5, %v325_v51  ;;  %v388_v4 = vld [vmem:[#allocation4] sm:$0xff]  ;;  %v389_v5 = vld [vmem:[#allocation4 + $0x8] sm:$0xff] }
  0x76   : > { %v345_v56 = vmul.f32 %v1062_v7, %v326_v53  ;;  %v346_v57 = vmul.f32 %v1067_v9, %v327_v54  ;;  %v347_v58 = vmul.f32 %v1070_v11, %v328_v55  ;;  %v348_v59 = vmul.f32 %v672_v29, %v329_v52 }
  0x77   : > { %v421_v53 = vrot.slane (%p282_p10), %v420_v45, 2  ;;  %v427_v54 = vrot.slane (%p282_p10), %v426_v46, 2 }
  0x78   : > { %v349_v60 = vadd.f32 %v346_v57, %v345_v56  ;;  %v416_v57 = vadd.f32 (%p282_p10), %v415_v49, %v414_v41 }
  0x7a   : > { %v350_v61 = vadd.f32 %v349_v60, %v347_v58  ;;  %v433_v58 = vrot.slane (%p282_p10), %v432_v50, 2 }
  0x7c   : > { %v351_v62 = vadd.f32 %v350_v61, %v348_v59  ;;  %v422_v61 = vadd.f32 (%p282_p10), %v421_v53, %v420_v45 }
  0x7e   : > { %v352_v0 = vsub.f32 0.0, %v351_v62  ;;  %v353_v1 = vmul.f32 1.442695, %v351_v62  ;;  %v428_v62 = vadd.f32 (%p282_p10), %v427_v54, %v426_v46 }
  0x80   : > { %v359_v3 = vmul.f32 %v668_v63, %v352_v0  ;;  %761 = vpow2.f32 %v353_v1  ;;  %v417_v1 = vrot.slane (%p282_p10), %v416_v57, 1 }
  0x82   : > { %v392_v12 = vmul.f32 %v1062_v7, %v359_v3  ;;  %v393_v13 = vmul.f32 %v1067_v9, %v359_v3  ;;  %v394_v14 = vmul.f32 %v1070_v11, %v359_v3  ;;  %v395_v15 = vmul.f32 %v672_v29, %v359_v3 }
  0x83   : > { %v434_v3 = vadd.f32 (%p282_p10), %v433_v58, %v432_v50 }
  0x84   : > { %v396_v2 = vadd.f32 %v392_v12, %v388_v4  ;;  %v397_v16 = vadd.f32 %v393_v13, %v389_v5  ;;  %v398_v17 = vadd.f32 %v394_v14, %v390_v8  ;;  %v399_v18 = vadd.f32 %v395_v15, %v391_v10  ;;  %v454_v13 = vld [vmem:[#allocation3] sm:$0xff] (%p282_p10)  ;;  %v455_v14 = vld [vmem:[#allocation3 + $0x18] sm:$0xff] (%p282_p10) }
  0x85   : > { %v423_v10 = vrot.slane (%p282_p10), %v422_v61, 1  ;;  %v429_v12 = vrot.slane (%p282_p10), %v428_v62, 1 }
  0x86   : > { %400 = vst [vmem:[#allocation4] sm:$0xff] %v396_v2  ;;  %401 = vst [vmem:[#allocation4 + $0x8] sm:$0xff] %v397_v16  ;;  %v418_v16 = vadd.f32 (%p282_p10), %v417_v1, %v416_v57 }
  0x87   : > { %402 = vst [vmem:[#allocation4 + $0x10] sm:$0xff] %v398_v17  ;;  %403 = vst [vmem:[#allocation4 + $0x18] sm:$0xff] %v399_v18  ;;  %v435_v17 = vrot.slane (%p282_p10), %v434_v3, 1  ;;  %v456_v18 = vld [vmem:[#allocation3 + $0x8] sm:$0xff] (%p282_p10) }
  0x8d   : > { %v762_v6 = vpop.eup %761  ;;  %v494_v9 = vld [vmem:[#allocation4] sm:$0xff] (%p282_p10)  ;;  %v495_v11 = vld [vmem:[#allocation4 + $0x8] sm:$0xff] (%p282_p10) }
  0x8e   : > { %v355_v19 = vsub.f32 1.0, %v762_v6  ;;  %v496_v24 = vld [vmem:[#allocation4 + $0x10] sm:$0xff] (%p282_p10)  ;;  %v497_v25 = vld [vmem:[#allocation4 + $0x18] sm:$0xff] (%p282_p10)  ;;  %v498_v26 = vrot.slane (%p282_p10), %v494_v9, 4  ;;  %v504_v27 = vrot.slane (%p282_p10), %v495_v11, 4 }
  0x8f   : > { %v510_v29 = vrot.slane (%p282_p10), %v496_v24, 4  ;;  %v516_v30 = vrot.slane (%p282_p10), %v497_v25, 4 }
  0x90   : > { %v356_v20 = vmul.f32 %v355_v19, %v355_v19  ;;  %v499_v35 = vadd.f32 (%p282_p10), %v498_v26, %v494_v9  ;;  %v505_v36 = vadd.f32 (%p282_p10), %v504_v27, %v495_v11  ;;  %v424_v19 = vadd.f32 (%p282_p10), %v423_v10, %v422_v61 }
  0x91   : > { %v511_v39 = vadd.f32 (%p282_p10), %v510_v29, %v496_v24  ;;  %v517_v40 = vadd.f32 (%p282_p10), %v516_v30, %v497_v25  ;;  %v458_v9 = vrot.slane (%p282_p10), %v454_v13, 4  ;;  %v464_v11 = vrot.slane (%p282_p10), %v455_v14, 4 }
  0x92   : > { %v357_v21 = vmul.f32 %v356_v20, %v352_v0  ;;  %v500_v43 = vrot.slane (%p282_p10), %v499_v35, 2  ;;  %v506_v44 = vrot.slane (%p282_p10), %v505_v36, 2  ;;  %v430_v20 = vadd.f32 (%p282_p10), %v429_v12, %v428_v62 }
  0x93   : > { %v512_v47 = vrot.slane (%p282_p10), %v511_v39, 2  ;;  %v518_v48 = vrot.slane (%p282_p10), %v517_v40, 2  ;;  %v442_v25 = vsel (%p282_p10), %vm441_vm5, %v424_v19, %v418_v16  ;;  %v470_v27 = vrot.slane (%p282_p10), %v456_v18, 4 }
  0x94   : > { %v358_v23 = vmul.f32 %v668_v63, %v357_v21  ;;  %408 = sbr.rel (!%p282_p10) target bundleno = 311 (0x137), region = 44  ;;  %v501_v51 = vadd.f32 (%p282_p10), %v500_v43, %v499_v35  ;;  %v507_v52 = vadd.f32 (%p282_p10), %v506_v44, %v505_v36  ;;  %v444_v29 = vsel (%p282_p10), %vm443_vm6, %v430_v20, %v442_v25 }
  0x95   : > { %v513_v55 = vadd.f32 (%p282_p10), %v512_v47, %v511_v39  ;;  %v519_v56 = vadd.f32 (%p282_p10), %v518_v48, %v517_v40  ;;  %v459_v30 = vadd.f32 (%p282_p10), %v458_v9, %v454_v13  ;;  %v465_v31 = vadd.f32 (%p282_p10), %v464_v11, %v455_v14 }
  0x96   : > { %v405_v7 = vadd.f32 %v404_v22, %v358_v23  ;;  %v502_v59 = vrot.slane (%p282_p10), %v501_v51, 1  ;;  %v508_v60 = vrot.slane (%p282_p10), %v507_v52, 1  ;;  %v436_v23 = vadd.f32 (%p282_p10), %v435_v17, %v434_v3 }
  0x97   : > { %v514_v63 = vrot.slane (%p282_p10), %v513_v55, 1  ;;  %v520_v0 = vrot.slane (%p282_p10), %v519_v56, 1  ;;  %v471_v34 = vadd.f32 (%p282_p10), %v470_v27, %v456_v18  ;;  %v460_v37 = vrot.slane (%p282_p10), %v459_v30, 2 }
  0x98   : > { %406 = vst [vmem:[#allocation5] sm:$0xff] %v405_v7  ;;  %v503_v5 = vadd.f32 (%p282_p10), %v502_v59, %v501_v51  ;;  %v509_v8 = vadd.f32 (%p282_p10), %v508_v60, %v507_v52  ;;  %v457_v7 = vld [vmem:[#allocation3 + $0x10] sm:$0xff] (%p282_p10)  ;;  %v446_v32 = vsel (%p282_p10), %vm445_vm7, %v436_v23, %v444_v29  ;;  %v466_v38 = vrot.slane (%p282_p10), %v465_v31, 2 }
  0x99   : > { %v515_v15 = vadd.f32 %v514_v63, %v513_v55  ;;  %v521_v2 = vadd.f32 %v520_v0, %v519_v56  ;;  %v476_v35 = vrot.slane %v457_v7, 4  ;;  %v449_v36 = vsel %vm448_vm8, %v446_v32, 0.0 }
  0x9a   : > { %v526_v6 = vsel %vm441_vm5, %v509_v8, %v503_v5  ;;  %450 = vadd.xlane.f32.xlu0 %v449_v36  ;;  %v472_v40 = vrot.slane %v471_v34, 2  ;;  %v461_v42 = vadd.f32 %v460_v37, %v459_v30  ;;  %v467_v43 = vadd.f32 %v466_v38, %v465_v31 }
  0x9b   : > { %v527_v22 = vsel %vm443_vm6, %v515_v15, %v526_v6  ;;  %v477_v41 = vadd.f32 %v476_v35, %v457_v7 }
  0x9c   : > { %v528_v24 = vsel %vm445_vm7, %v521_v2, %v527_v22  ;;  %v473_v45 = vadd.f32 %v472_v40, %v471_v34  ;;  %v462_v47 = vrot.slane %v461_v42, 1  ;;  %v468_v48 = vrot.slane %v467_v43, 1 }
  0x9d   : > { %v530_v28 = vsel %vm448_vm8, %v528_v24, 0.0  ;;  %v478_v46 = vrot.slane %v477_v41, 2 }
  0x9e   : > { %531 = vadd.xlane.f32.xlu1 %v530_v28  ;;  %v474_v50 = vrot.slane %v473_v45, 1  ;;  %v463_v52 = vadd.f32 %v462_v47, %v461_v42  ;;  %v469_v53 = vadd.f32 %v468_v48, %v467_v43 }
  0x9f   : > { %v534_v4 = vld [vmem:[#allocation5] sm:$0xff]  ;;  %v479_v51 = vadd.f32 %v478_v46, %v477_v41 }
  0xa0   : > { %v535_v21 = vrot.slane %v534_v4, 4  ;;  %v475_v54 = vadd.f32 %v474_v50, %v473_v45  ;;  %v486_v56 = vsel %vm441_vm5, %v469_v53, %v463_v52 }
  0xa1   : > { %v480_v55 = vrot.slane %v479_v51, 1 }
  0xa2   : > { %v536_v26 = vadd.f32 %v535_v21, %v534_v4  ;;  %v487_v58 = vsel %vm443_vm6, %v475_v54, %v486_v56 }
  0xa3   : > { %v481_v57 = vadd.f32 %v480_v55, %v479_v51 }
  0xa4   : > { %v537_v33 = vrot.slane %v536_v26, 2 }
  0xa5   : > { %v488_v59 = vsel %vm445_vm7, %v481_v57, %v487_v58 }
  0xa6   : > { %v538_v39 = vadd.f32 %v537_v33, %v536_v26  ;;  %v490_v60 = vsel %vm448_vm8, %v488_v59, 0.0 }
  0xa7   : > { %491 = vadd.xlane.f32.xlu0 %v490_v60 }
  0xa8   : > { %v539_v44 = vrot.slane %v538_v39, 1 }
  0xaa   : > { %v540_v49 = vadd.f32 %v539_v44, %v538_v39 }
  0xac   : > { %541 = vadd.xlane.f32.xlu1 %v540_v49 }
 0x123   : > { %v451_v62 = vpop.xlane.xlu0 %450 }
 0x124   : > { %453 = vst.msk [vmem:[%s1159_s2] sm:$0xf] %vm452_vm9, %v451_v62 }
 0x127   : > { %v532_v61 = vpop.xlane.xlu1 %531 }
 0x128   : > { %533 = vst.msk [vmem:[%s1161_s4] sm:$0xf] %vm452_vm9, %v532_v61 }
 0x130   : > { %v492_v0 = vpop.xlane.xlu0 %491 }
 0x131   : > { %493 = vst.msk [vmem:[%s1160_s3] sm:$0xf] %vm452_vm9, %v492_v0 }
 0x135   : > { %v542_v63 = vpop.xlane.xlu1 %541 }
 0x136   : > { %544 = vst.msk [vmem:[#allocation11] sm:$0x1] %vm543_vm10, %v542_v63 }
 0x137 PF: > { %s1168_s17 = sadd.s32 4294967295, %s901_s23   ;;  %s909_s26 = smov [#allocation11]  }
 0x138   : > { %p1124_p7 = scmp.eq.s32.totalorder %s1168_s17, 1  ;;  %s561_s11 = sshll.u32 %s909_s26, 4  ;;  %s562_s11 = int_to_ptr.vmem [resolvable:$true] %s561_s11 }
 0x139   : > { %s819_s13 = scalar_lea.vmem %s562_s11, 16  ;;  %s825_s15 = scalar_lea.vmem %s562_s11, 32 }
 0x13a   : > { %p820_p3 = scmp.ne.s32.totalorder %s562_s11, %s819_s13  ;;  %p826_p6 = scmp.lt.s32.totalorder %s562_s11, %s562_s11 }
 0x13b   : > { %p827_p8 = scmp.lt.s32.totalorder %s825_s15, %s819_s13 }
 0x13c   : > { %p821_p4 = pnand %p820_p3, %p1124_p7 }
 0x13d   : > { %p828_p11 = por %p827_p8, %p826_p6 }
 0x13e   : > { %p822_p5 = pneg %p821_p4 }
 0x140   : > { %p829_p12 = pnand %p828_p11, %p822_p5 }
 0x142   : > { %832 = shalt.err (!%p829_p12)
}
 0x143   : > { %685 = dma.vmem_to_hbm [thread:$0]  (%p1124_p7), %s562_s11, 16, %s1162_s5, [#allocation8]  }
 0x144   : > { %876 = dma.done.wait (%p1124_p7), [#allocation8], 16  }
 0x145   : > { %878 = vsyncadd (%p1124_p7), [#allocation8], 4294967280 }
 0x146 PF: > { %s23_s23 = sadd.s32 1, %s901_s23   ;;  %s1170_s18 = smov %s885_s19 }
 0x147   : > { %p20_p13 = scmp.ge.s32.totalorder %s23_s23, 4   ;;  %s1171_s19 = smov %s889_s20 }
 0x148   : > { %s1172_s20 = smov %s991_s30  ;;  %s1173_s21 = smov %s897_s22 }
 0x149   : > { %s1174_s22 = smov %s1176_s25  ;;  %22 = sbr.rel (!%p20_p13) target bundleno = 7 (0x7), region = 110 }
 0x14e   :  { %583 = vsyncpa [#allocation7], 1 }
 0x14f   :  { %585 = vsyncpa [#allocation7 + $0x1], 1 }
 0x150   :  { %586 = vsyncpa [#allocation10], 1 }
 0x151   :  { %588 = vsyncpa [#allocation10 + $0x1], 1 }
 0x152   :  { %589 = vsyncpa [#allocation8], 1 }
 0x153   :  { %591 = vsyncpa [#allocation8 + $0x1], 1 }

</bundles_post_ra>
